<compile_context>
chip_gen: v6e
topology: v6e:2x2x1
jax: 0.10.0
libtpu: 0.0.40
codegen_flags: <defaults>
</compile_context>

<pallas_src>
import numpy as np
import jax
import jax.numpy as jnp
from jax import lax
from jax.experimental import pallas as pl
from jax.experimental.pallas import tpu as pltpu

NUM_CLASSES = 6
LANES = 128
ROW_CAP = 2048          # rows per tile: 2048*128*4B = 1 MiB per f32 input block
# Deterministic "parameter" table from the module's forward().
CLASS_WEIGHTS = np.array(
    [0.01988008, 4.06510283, 0.01988008, 0.38680778, 0.04662644, 0.48158286],
    dtype=np.float32,
)


def _make_kernel(alpha, gamma, beta, rows, tile_rows, tiles_per_split, needs_mask):
    b = float(np.e ** (gamma / alpha) - 1.0)
    alpha_over_b = float(alpha / b)
    b_over_beta = float(b / beta)                 # fold the /beta divide away
    lin_const = float(gamma / b - alpha * beta)
    alpha = float(alpha)
    gamma = float(gamma)
    beta = float(beta)

    def kernel(pred_ref, target_ref, out_ref):
        c = pl.program_id(0)          # "parallel" slice (one per TC on v7x)
        t = pl.program_id(1)          # "arbitrary" reduction step in the slice

        @pl.when(t == 0)
        def _init():
            out_ref[...] = jnp.zeros_like(out_ref)

        pred = pred_ref[...].astype(jnp.float32)
        target = target_ref[...].astype(jnp.float32)
        diff = jnp.abs(pred - target)
        loss = jnp.where(
            diff < beta,
            alpha_over_b * (b * diff + 1.0) * jnp.log(b_over_beta * diff + 1.0)
            - alpha * diff,
            gamma * diff + lin_const,
        )

        if needs_mask:
            # Rows past the logical end (ragged last block / clamped
            # fully-out-of-range tiles) contribute exactly zero.
            row = lax.broadcasted_iota(jnp.int32, loss.shape, 0)
            global_row = (c * tiles_per_split + t) * tile_rows + row
            loss = jnp.where(global_row < rows, loss, 0.0)

        # (8,128) output-resident vector accumulator: pure VALU vreg adds.
        # The single cross-lane reduce to a scalar happens in the JAX epilogue.
        if tile_rows % 8 == 0:
            out_ref[...] += loss.reshape(tile_rows // 8, 8, LANES).sum(axis=0)
        else:
            out_ref[0:1, :] += jnp.sum(loss, axis=0, keepdims=True)

    return kernel


def imbalanced_l1_loss_tpu(
    pred,
    target,
    labels,
    *,
    alpha=0.5,
    gamma=1.5,
    beta=1.0,
    reduction="mean",
    loss_weight=1.0,
):
    assert beta > 0
    assert pred.shape == target.shape
    total = int(np.prod(pred.shape))
    assert total > 0

    # ---- lane-dense input layout: flatten; pad at most 127 zero elements so
    # the reshape to (rows, 128) is valid.  Zero pad contributes loss == 0.
    pred_flat = pred.reshape(-1)
    target_flat = target.reshape(-1)
    pad = (-total) % LANES
    if pad:
        pred_flat = jnp.pad(pred_flat, (0, pad))
        target_flat = jnp.pad(target_flat, (0, pad))
    rows = (total + pad) // LANES
    pred_ld = pred_flat.reshape(rows, LANES)
    target_ld = target_flat.reshape(rows, LANES)

    # ---- tiling / TensorCore split
    tile_rows = rows if rows <= ROW_CAP else ROW_CAP
    num_tiles_total = pl.cdiv(rows, tile_rows)
    num_splits = 2 if num_tiles_total >= 2 else 1   # one slice per TC on v7x
    tiles_per_split = pl.cdiv(num_tiles_total, num_splits)
    needs_mask = (num_splits * tiles_per_split * tile_rows) != rows
    last_block = num_tiles_total - 1

    def in_index(c, t):
        g = c * tiles_per_split + t
        # Clamp logical tiles starting past the end onto the last real block;
        # their contribution is masked to zero in-kernel.
        return (jnp.minimum(g, last_block), 0)

    kernel = _make_kernel(
        alpha, gamma, beta, rows, tile_rows, tiles_per_split, needs_mask
    )

    partials = pl.pallas_call(
        kernel,
        out_shape=jax.ShapeDtypeStruct((num_splits * 8, LANES), jnp.float32),
        grid=(num_splits, tiles_per_split),
        in_specs=[
            pl.BlockSpec((tile_rows, LANES), in_index),
            pl.BlockSpec((tile_rows, LANES), in_index),
        ],
        out_specs=pl.BlockSpec((8, LANES), lambda c, t: (c, 0)),
        compiler_params=pltpu.CompilerParams(
            dimension_semantics=("parallel", "arbitrary"),
            vmem_limit_bytes=32 * 1024 * 1024,      # safe on v5e/v6e/v7x
        ),
    )(pred_ld, target_ld)

    # ---- trivial JAX epilogue: final reduce + scale + class-weight lookup.
    loss_sum = jnp.sum(partials)
    if reduction == "mean":
        red = loss_sum * (float(loss_weight) / float(total))
    elif reduction == "sum":
        red = loss_sum * float(loss_weight)
    else:
        # TODO(synk): reduction='none' (per-element output) and the optional
        # `weight` / `avg_factor` paths of @weighted_loss are not wired here
        # (module defaults are reduction='mean', weight=None, avg_factor=None).
        raise ValueError("only 'mean' / 'sum' reductions are supported")

    labels = labels.reshape(-1).astype(jnp.int32)
    cw = jnp.asarray(CLASS_WEIGHTS)
    # NOTE: out-of-range / negative labels silently get weight 0.0 (torch's
    # one_hot would raise) -- documented divergence, same as previous kernel.
    valid = (labels >= 0) & (labels < NUM_CLASSES)
    sample_w = jnp.where(valid, cw[jnp.clip(labels, 0, NUM_CLASSES - 1)], 0.0)
    return sample_w * red


def _reference(pred, target, labels, alpha=0.5, gamma=1.5, beta=1.0,
               loss_weight=1.0):
    diff = jnp.abs(pred.astype(jnp.float32) - target.astype(jnp.float32))
    b = np.e ** (gamma / alpha) - 1.0
    loss = jnp.where(
        diff < beta,
        alpha / b * (b * diff + 1.0) * jnp.log(b * diff / beta + 1.0)
        - alpha * diff,
        gamma * diff + gamma / b - alpha * beta,
    )
    red = jnp.mean(loss)
    cw = jnp.asarray(CLASS_WEIGHTS)
    sample_w = cw[labels]
    return sample_w * loss_weight * red


if __name__ == "__main__":
    key = jax.random.PRNGKey(0)
    k1, k2, k3 = jax.random.split(key, 3)

    N, D = 64, 4  # N bbox samples, 4 box-regression coords
    pred = jax.random.normal(k1, (N, D), dtype=jnp.float32)
    target = jax.random.normal(k2, (N, D), dtype=jnp.float32)
    labels = jax.random.randint(k3, (N,), 0, NUM_CLASSES)

    out = imbalanced_l1_loss_tpu(pred, target, labels)
    out = jax.block_until_ready(out)

    ref = _reference(pred, target, labels)
    assert out.shape == (N,)
    assert np.allclose(np.asarray(out), np.asarray(ref), rtol=1e-5, atol=1e-6)

    print("KERNEL_OK")
</pallas_src>

<mosaic_0001>
module attributes {stable_mosaic.version = 11 : i64} {
  func.func @kernel(%arg0: i32, %arg1: i32, %arg2: memref<2x128xf32, #tpu.memory_space<vmem>>, %arg3: memref<2x128xf32, #tpu.memory_space<vmem>>, %arg4: memref<8x128xf32, #tpu.memory_space<vmem>>) attributes {dimension_semantics = [#tpu.dimension_semantics<parallel>, #tpu.dimension_semantics<arbitrary>], iteration_bounds = array<i64: 1, 1>, scalar_prefetch = 0 : i64, scratch_operands = 0 : i64, tpu.core_type = #tpu.core_type<tc>, window_params = [{transform_indices = @transform_0, window_bounds = array<i64: 2, 128>}, {transform_indices = @transform_1, window_bounds = array<i64: 2, 128>}, {transform_indices = @transform_2, window_bounds = array<i64: 8, 128>}]} {
    %c0_i32 = arith.constant 0 : i32
    %0 = arith.cmpi eq, %arg1, %c0_i32 : i32
    %1 = arith.extui %0 : i1 to i32
    %c0_i32_0 = arith.constant 0 : i32
    %2 = arith.cmpi ne, %1, %c0_i32_0 : i32
    scf.if %2 {
      %cst_17 = arith.constant 0.000000e+00 : f32
      %34 = vector.broadcast %cst_17 : f32 to vector<8x128xf32>
      %c0_18 = arith.constant 0 : index
      %c0_19 = arith.constant 0 : index
      %35 = vector.load %arg4[%c0_18, %c0_19] : memref<8x128xf32, #tpu.memory_space<vmem>>, vector<8x128xf32>
      tpu.vector_store %arg4[%c0_18, %c0_19], %34 {strides = array<i32>} : memref<8x128xf32, #tpu.memory_space<vmem>>, vector<8x128xf32>,
    } else {
    }
    %c0 = arith.constant 0 : index
    %c0_1 = arith.constant 0 : index
    %3 = vector.load %arg2[%c0, %c0_1] : memref<2x128xf32, #tpu.memory_space<vmem>>, vector<2x128xf32>
    %c0_2 = arith.constant 0 : index
    %c0_3 = arith.constant 0 : index
    %4 = vector.load %arg3[%c0_2, %c0_3] : memref<2x128xf32, #tpu.memory_space<vmem>>, vector<2x128xf32>
    %5 = arith.subf %3, %4 : vector<2x128xf32>
    %6 = math.absf %5 : vector<2x128xf32>
    %cst = arith.constant 1.000000e+00 : f32
    %7 = vector.broadcast %cst : f32 to vector<2x128xf32>
    %8 = arith.cmpf olt, %6, %7 : vector<2x128xf32>
    %cst_4 = arith.constant 19.085537 : f32
    %9 = vector.broadcast %cst_4 : f32 to vector<2x128xf32>
    %10 = arith.mulf %9, %6 : vector<2x128xf32>
    %cst_5 = arith.constant 1.000000e+00 : f32
    %11 = vector.broadcast %cst_5 : f32 to vector<2x128xf32>
    %12 = arith.addf %10, %11 : vector<2x128xf32>
    %cst_6 = arith.constant 0.0261978488 : f32
    %13 = vector.broadcast %cst_6 : f32 to vector<2x128xf32>
    %14 = arith.mulf %13, %12 : vector<2x128xf32>
    %cst_7 = arith.constant 19.085537 : f32
    %15 = vector.broadcast %cst_7 : f32 to vector<2x128xf32>
    %16 = arith.mulf %15, %6 : vector<2x128xf32>
    %cst_8 = arith.constant 1.000000e+00 : f32
    %17 = vector.broadcast %cst_8 : f32 to vector<2x128xf32>
    %18 = arith.addf %16, %17 : vector<2x128xf32>
    %19 = math.log %18 : vector<2x128xf32>
    %20 = arith.mulf %14, %19 : vector<2x128xf32>
    %cst_9 = arith.constant 5.000000e-01 : f32
    %21 = vector.broadcast %cst_9 : f32 to vector<2x128xf32>
    %22 = arith.mulf %21, %6 : vector<2x128xf32>
    %23 = arith.subf %20, %22 : vector<2x128xf32>
    %cst_10 = arith.constant 1.500000e+00 : f32
    %24 = vector.broadcast %cst_10 : f32 to vector<2x128xf32>
    %25 = arith.mulf %24, %6 : vector<2x128xf32>
    %cst_11 = arith.constant -0.421406448 : f32
    %26 = vector.broadcast %cst_11 : f32 to vector<2x128xf32>
    %27 = arith.addf %25, %26 : vector<2x128xf32>
    %28 = arith.select %8, %23, %27 : vector<2x128xi1>, vector<2x128xf32>
    %c0_12 = arith.constant 0 : index
    %c0_13 = arith.constant 0 : index
    %29 = vector.load %arg4[%c0_12, %c0_13] : memref<8x128xf32, #tpu.memory_space<vmem>>, vector<1x128xf32>
    %cst_14 = arith.constant dense<0.000000e+00> : vector<128xf32>
    %30 = vector.multi_reduction <add>, %28, %cst_14 [0] : vector<2x128xf32> to vector<128xf32>
    %31 = vector.shape_cast %30 : vector<128xf32> to vector<1x128xf32>
    %32 = arith.addf %29, %31 : vector<1x128xf32>
    %c0_15 = arith.constant 0 : index
    %c0_16 = arith.constant 0 : index
    %33 = vector.load %arg4[%c0_15, %c0_16] : memref<8x128xf32, #tpu.memory_space<vmem>>, vector<1x128xf32>
    tpu.vector_store %arg4[%c0_15, %c0_16], %32 {strides = array<i32>} : memref<8x128xf32, #tpu.memory_space<vmem>>, vector<1x128xf32>,
    return
  }
  func.func @transform_0(%arg0: i32, %arg1: i32) -> (i32, i32) {
    %c1_i32 = arith.constant 1 : i32
    %0 = arith.muli %arg0, %c1_i32 : i32
    %1 = arith.addi %0, %arg1 : i32
    %c0_i32 = arith.constant 0 : i32
    %2 = arith.minsi %1, %c0_i32 : i32
    %c0_i32_0 = arith.constant 0 : i32
    %c0_i32_1 = arith.constant 0 : i32
    return %2, %c0_i32_0 : i32, i32
  }
  func.func @transform_1(%arg0: i32, %arg1: i32) -> (i32, i32) {
    %c1_i32 = arith.constant 1 : i32
    %0 = arith.muli %arg0, %c1_i32 : i32
    %1 = arith.addi %0, %arg1 : i32
    %c0_i32 = arith.constant 0 : i32
    %2 = arith.minsi %1, %c0_i32 : i32
    %c0_i32_0 = arith.constant 0 : i32
    %c0_i32_1 = arith.constant 0 : i32
    return %2, %c0_i32_0 : i32, i32
  }
  func.func @transform_2(%arg0: i32, %arg1: i32) -> (i32, i32) {
    %c0_i32 = arith.constant 0 : i32
    %c0_i32_0 = arith.constant 0 : i32
    return %arg0, %c0_i32 : i32, i32
  }
}

</mosaic_0001>

<bundles_post_ra>
// kernel: tpu_custom_call.1
= control target key start
LH: loop header
LB: loop body
LE: loop exit
PB: predicated region body
PF: predicated region fallthrough
CT: control target
= control target key end

     0   :  { %7 = vsyncpa [#allocation3], 0  ;;  %s204_s0 = inlined_call_operand.hbm [shape: f32[2,128], index: 0, kind: input, shape index: {}]   ;;  %s205_s1 = inlined_call_operand.hbm [shape: f32[2,128], index: 1, kind: input, shape index: {}]   ;;  %s206_s2 = inlined_call_operand.hbm [shape: f32[8,128], index: 2, kind: output, shape index: {}]  }
   0x1   :  { %8 = vsyncpa [#allocation6], 0 }
   0x2   :  { %9 = vsyncpa [#allocation4], 0  ;;  %s176_s9 = smov [#allocation2]   ;;  %s177_s11 = smov [#allocation5]  }
   0x3   :  { %s21_s10 = sshll.u32 %s176_s9, 4  ;;  %s36_s12 = sshll.u32 %s177_s11, 4  ;;  %s22_s10 = int_to_ptr.vmem [resolvable:$true] %s21_s10  ;;  %s37_s12 = int_to_ptr.vmem [resolvable:$true] %s36_s12 }
   0x4   :  { %s118_s13 = scalar_lea.vmem %s22_s10, 32  ;;  %p123_p1 = scmp.lt.s32.totalorder %s22_s10, %s22_s10 }
   0x5   :  { %p119_p0 = scmp.ne.s32.totalorder %s22_s10, %s118_s13  ;;  %p124_p2 = scmp.lt.s32.totalorder %s118_s13, %s118_s13 }
   0x7   :  { %p125_p3 = por %p124_p2, %p123_p1 }
   0x9   :  { %p126_p4 = pnand %p125_p3, %p119_p0 }
   0xb   :  { %129 = shalt.err (!%p126_p4)
}
   0xc   :  { %24 = dma.hbm_to_vmem [thread:$0]  %s204_s0, 32, %s22_s10, [#allocation3]  }
   0xd   :  { %s138_s16 = scalar_lea.vmem %s37_s12, 32  ;;  %p143_p6 = scmp.lt.s32.totalorder %s37_s12, %s37_s12 }
   0xe   :  { %p139_p5 = scmp.ne.s32.totalorder %s37_s12, %s138_s16  ;;  %p144_p7 = scmp.lt.s32.totalorder %s138_s16, %s138_s16 }
  0x10   :  { %p145_p8 = por %p144_p7, %p143_p6 }
  0x12   :  { %p146_p9 = pnand %p145_p8, %p139_p5 }
  0x14   :  { %149 = shalt.err (!%p146_p9)
}
  0x15   :  { %39 = dma.hbm_to_vmem [thread:$0]  %s205_s1, 32, %s37_s12, [#allocation6]  }
  0x16   :  { %170 = dma.done.wait [#allocation3], 32  }
  0x17   :  { %171 = vsyncadd [#allocation3], 4294967264 }
  0x18   :  { %172 = dma.done.wait [#allocation6], 32  }
  0x19   :  { %173 = vsyncadd [#allocation6], 4294967264  ;;  %v178_v0 = vmov 0.0   ;;  %v57_v1 = vld [vmem:[#allocation2] sm:$0x3]  ;;  %vm74_vm1 = vcmask 1041408  }
  0x1a   :  { %56 = vst [vmem:[#allocation7] sm:$0xff] %v178_v0  ;;  %v58_v2 = vld [vmem:[#allocation5] sm:$0x3]  ;;  %s179_s0 = smov [#allocation7]  }
  0x1b   :  { %v59_v3 = vsub.f32 %v57_v1, %v58_v2  ;;  %s90_s1 = sshll.u32 %s179_s0, 4  ;;  %s91_s1 = int_to_ptr.vmem [resolvable:$true] %s90_s1 }
  0x1c   :  { %s150_s19 = scalar_lea.vmem %s91_s1, 128  ;;  %p155_p11 = scmp.lt.s32.totalorder %s91_s1, %s91_s1 }
  0x1d   :  { %v60_v4 = vand.u32 2147483647, %v59_v3  ;;  %p151_p10 = scmp.ne.s32.totalorder %s91_s1, %s150_s19  ;;  %p156_p12 = scmp.lt.s32.totalorder %s150_s19, %s150_s19 }
  0x1f   :  { %v62_v5 = vmul.f32 19.085537, %v60_v4  ;;  %v70_v8 = vmul.f32 1.5, %v60_v4  ;;  %v68_v11 = vmul.f32 0.5, %v60_v4  ;;  %vm61_vm0 = vcmp.lt.f32.partialorder %v60_v4, 1.0  ;;  %p157_p13 = por %p156_p12, %p155_p11 }
  0x21   :  { %v63_v6 = vadd.f32 1.0, %v62_v5  ;;  %v71_v13 = vadd.f32 -0.42140645, %v70_v8  ;;  %v73_v22 = vld [vmem:[#allocation7] sm:$0x1]  ;;  %p158_p0 = pnand %p157_p13, %p151_p10 }
  0x23   :  { %108 = vlog2.f32 %v63_v6  ;;  %v64_v7 = vmul.f32 0.026197849, %v63_v6 }
  0x30   :  { %v109_v9 = vpop.eup %108 }
  0x31   :  { %v66_v10 = vmul.f32 0.6931472, %v109_v9 }
  0x33   :  { %v67_v12 = vmul.f32 %v66_v10, %v64_v7 }
  0x35   :  { %v69_v14 = vsub.f32 %v67_v12, %v68_v11 }
  0x37   :  { %v72_v15 = vsel %vm61_vm0, %v69_v14, %v71_v13 }
  0x38   :  { %v75_v16 = vsel %vm74_vm1, %v72_v15, 0.0 }
  0x39   :  { %v76_v17 = vrot.slane %v75_v16, 4 }
  0x3b   :  { %v77_v18 = vadd.f32 %v76_v17, %v75_v16 }
  0x3d   :  { %v78_v19 = vrot.slane %v77_v18, 2 }
  0x3f   :  { %v79_v20 = vadd.f32 %v78_v19, %v77_v18 }
  0x41   :  { %v80_v21 = vrot.slane %v79_v20, 1 }
  0x43   :  { %v81_v23 = vadd.f32 %v80_v21, %v79_v20 }
  0x45   :  { %v82_v24 = vadd.f32 %v81_v23, %v73_v22 }
  0x47   :  { %83 = vst [vmem:[#allocation7] sm:$0x1] %v82_v24 }
  0x48   :  { %161 = shalt.err (!%p158_p0)
}
  0x49   :  { %93 = dma.vmem_to_hbm [thread:$0]  %s91_s1, 128, %s206_s2, [#allocation4]  }
  0x4a   :  { %174 = dma.done.wait [#allocation4], 128  }
  0x4b   :  { %175 = vsyncadd [#allocation4], 4294967168 }
  0x4c   :  { %97 = vsyncpa [#allocation3], 1 }
  0x4d   :  { %98 = vsyncpa [#allocation6], 1 }
  0x4e   :  { %99 = vsyncpa [#allocation4], 1 }

</bundles_post_ra>
